<compile_context>
chip_gen: v7x
topology: tpu7x:2x2x1
jax: 0.10.0
libtpu: 0.0.40
codegen_flags: <defaults>
</compile_context>

<pallas_src>
import jax
import jax.numpy as jnp
from jax.experimental import pallas as pl
from jax.experimental.pallas import tpu as pltpu

INPUT_SIZE = 5
OUTPUT_SIZE = 1
LANES = 128


def one_layer_kernel(x_ref, w_ref, b_ref, o_ref):
    # x_ref: VMEM (INPUT_SIZE, tbr, 128)  batch packed dense on sublanes+lanes
    # w_ref: SMEM (INPUT_SIZE,)           5 scalar weights
    # b_ref: SMEM (1,)                    scalar bias
    # o_ref: VMEM (tbr, 128)              sublane+lane dense output (unmasked vst)
    z = x_ref[0] * w_ref[0]                       # SMEM scalar broadcast on VPU
    for f in range(1, INPUT_SIZE):                # static unroll: 4 more mul+add
        z = z + x_ref[f] * w_ref[f]
    z = z + b_ref[0]
    # Exact sigmoid: exp on the EUP, exact divide (approx reciprocal was the
    # source of the previous >2e-3 error). exp overflow -> inf -> 0 is correct.
    o_ref[...] = 1.0 / (1.0 + jnp.exp(-z))


def one_layer_net_fm(x_fm, w, b, *, block_rows=1024):
    """Feature-major forward: x_fm (in=5, B) f32 -> (B, out=1) f32.

    Feature-major input avoids any HBM transpose: for B % 128 == 0 the reshape
    to (5, B//128, 128) is free and the kernel streams x straight from HBM.
    """
    feat, batch = x_fm.shape
    assert feat == INPUT_SIZE
    x_fm = x_fm.astype(jnp.float32)

    b_pad = pl.cdiv(batch, LANES) * LANES
    if b_pad != batch:
        # Pads at most 127 tail samples (demo shapes); supply B % 128 == 0 for
        # large batches and this copy disappears entirely.
        x_fm = jnp.pad(x_fm, ((0, 0), (0, b_pad - batch)))
    nrows = b_pad // LANES
    x3 = x_fm.reshape(INPUT_SIZE, nrows, LANES)   # free: row-major regroup

    # Batch tile: block_rows*128 samples per grid step.  Default 1024 rows =
    # 128K samples ~ 6.3 MiB double-buffered (input+output) -> fits every gen.
    tbr = min(block_rows, nrows)
    if nrows > 8 and pl.cdiv(nrows, tbr) < 2:
        # Keep >= 2 grid steps so "parallel" can shard across v7x's 2 TCs.
        tbr = max(8, ((nrows + 1) // 2 // 8) * 8)

    w_vec = w.reshape(INPUT_SIZE).astype(jnp.float32)
    b_vec = b.reshape(OUTPUT_SIZE).astype(jnp.float32)

    out = pl.pallas_call(
        one_layer_kernel,
        out_shape=jax.ShapeDtypeStruct((nrows, LANES), jnp.float32),
        grid=(pl.cdiv(nrows, tbr),),              # ragged last block handled by Pallas
        in_specs=[
            pl.BlockSpec((INPUT_SIZE, tbr, LANES), lambda i: (0, i, 0)),
            pl.BlockSpec(memory_space=pltpu.MemorySpace.SMEM),
            pl.BlockSpec(memory_space=pltpu.MemorySpace.SMEM),
        ],
        out_specs=pl.BlockSpec((tbr, LANES), lambda i: (i, 0)),
        compiler_params=pltpu.CompilerParams(
            dimension_semantics=("parallel",),
            vmem_limit_bytes=32 * 1024 * 1024,    # headroom if block_rows is raised
        ),
    )(x3, w_vec, b_vec)

    # Back to PyTorch's (B, out_features) layout; padded tail lanes (sigmoid(bias))
    # are sliced away here and never read otherwise.
    return out.reshape(b_pad)[:batch].reshape(batch, OUTPUT_SIZE)


def one_layer_net(x, w, b, **kwargs):
    """PyTorch-layout forward: x (B, in=5) -> (B, 1).

    Compatibility path: does one transpose.  Prefer building the features
    feature-major and calling one_layer_net_fm to keep the kernel copy-free.
    """
    return one_layer_net_fm(x.T, w, b, **kwargs)


if __name__ == "__main__":
    key = jax.random.PRNGKey(0)
    kw, kb, kx = jax.random.split(key, 3)

    # nn.Linear default init: uniform(-1/sqrt(in_features), 1/sqrt(in_features))
    bound = 1.0 / jnp.sqrt(jnp.float32(INPUT_SIZE))
    W = jax.random.uniform(kw, (OUTPUT_SIZE, INPUT_SIZE), jnp.float32, -bound, bound)
    b = jax.random.uniform(kb, (OUTPUT_SIZE,), jnp.float32, -bound, bound)

    # Spec's polynomial-feature input cat([x1, x2, x1*x2, x1^2, x2^2]), batch=2,
    # built feature-major (5, B) so the kernel path needs no transpose at all.
    x1 = jnp.array([33.0, 7.0], dtype=jnp.float32)
    x2 = jnp.array([81.0, 12.0], dtype=jnp.float32)
    x_fm = jnp.stack([x1, x2, x1 * x2, x1 ** 2, x2 ** 2], axis=0)   # (5, 2)
    x_bm = x_fm.T                                                   # (2, 5) PyTorch layout

    out = jax.block_until_ready(one_layer_net_fm(x_fm, W, b))
    ref = jax.nn.sigmoid(x_bm @ W.T + b)
    assert out.shape == (2, OUTPUT_SIZE)
    assert jnp.allclose(out, ref, atol=1e-5), (out, ref)

    # Moderate-magnitude inputs (sigmoid not saturated) through the
    # PyTorch-layout wrapper; exact epilogue now meets a tight tolerance.
    xr = jax.random.normal(kx, (64, INPUT_SIZE), jnp.float32)
    out_r = jax.block_until_ready(one_layer_net(xr, W, b))
    ref_r = jax.nn.sigmoid(xr @ W.T + b)
    assert out_r.shape == (64, OUTPUT_SIZE)
    assert jnp.allclose(out_r, ref_r, atol=1e-5), (out_r, ref_r)

    print("KERNEL_OK")
</pallas_src>

<mosaic_0001>
module attributes {stable_mosaic.version = 11 : i64} {
  func.func @one_layer_kernel(%arg0: i32, %arg1: memref<5x1x128xf32, #tpu.memory_space<vmem>>, %arg2: memref<5xf32, #tpu.memory_space<smem>>, %arg3: memref<1xf32, #tpu.memory_space<smem>>, %arg4: memref<1x128xf32, #tpu.memory_space<vmem>>) attributes {dimension_semantics = [#tpu.dimension_semantics<parallel>], iteration_bounds = array<i64: 1>, scalar_prefetch = 0 : i64, scratch_operands = 0 : i64, tpu.core_type = #tpu.core_type<tc>, window_params = [{transform_indices = @transform_0, window_bounds = array<i64: 5, 1, 128>}, {transform_indices = @transform_1, window_bounds = array<i64: 5>}, {transform_indices = @transform_2, window_bounds = array<i64: 1>}, {transform_indices = @transform_3, window_bounds = array<i64: 1, 128>}]} {
    %c0 = arith.constant 0 : index
    %c0_0 = arith.constant 0 : index
    %c0_1 = arith.constant 0 : index
    %0 = vector.load %arg1[%c0, %c0_0, %c0_1] : memref<5x1x128xf32, #tpu.memory_space<vmem>>, vector<1x1x128xf32>
    %1 = vector.shape_cast %0 : vector<1x1x128xf32> to vector<1x128xf32>
    %c0_2 = arith.constant 0 : index
    %2 = memref.load %arg2[%c0_2] : memref<5xf32, #tpu.memory_space<smem>>
    %3 = vector.broadcast %2 : f32 to vector<1x128xf32>
    %4 = arith.mulf %1, %3 : vector<1x128xf32>
    %c1 = arith.constant 1 : index
    %c0_3 = arith.constant 0 : index
    %c0_4 = arith.constant 0 : index
    %5 = vector.load %arg1[%c1, %c0_3, %c0_4] : memref<5x1x128xf32, #tpu.memory_space<vmem>>, vector<1x1x128xf32>
    %6 = vector.shape_cast %5 : vector<1x1x128xf32> to vector<1x128xf32>
    %c1_5 = arith.constant 1 : index
    %7 = memref.load %arg2[%c1_5] : memref<5xf32, #tpu.memory_space<smem>>
    %8 = vector.broadcast %7 : f32 to vector<1x128xf32>
    %9 = arith.mulf %6, %8 : vector<1x128xf32>
    %10 = arith.addf %4, %9 : vector<1x128xf32>
    %c2 = arith.constant 2 : index
    %c0_6 = arith.constant 0 : index
    %c0_7 = arith.constant 0 : index
    %11 = vector.load %arg1[%c2, %c0_6, %c0_7] : memref<5x1x128xf32, #tpu.memory_space<vmem>>, vector<1x1x128xf32>
    %12 = vector.shape_cast %11 : vector<1x1x128xf32> to vector<1x128xf32>
    %c2_8 = arith.constant 2 : index
    %13 = memref.load %arg2[%c2_8] : memref<5xf32, #tpu.memory_space<smem>>
    %14 = vector.broadcast %13 : f32 to vector<1x128xf32>
    %15 = arith.mulf %12, %14 : vector<1x128xf32>
    %16 = arith.addf %10, %15 : vector<1x128xf32>
    %c3 = arith.constant 3 : index
    %c0_9 = arith.constant 0 : index
    %c0_10 = arith.constant 0 : index
    %17 = vector.load %arg1[%c3, %c0_9, %c0_10] : memref<5x1x128xf32, #tpu.memory_space<vmem>>, vector<1x1x128xf32>
    %18 = vector.shape_cast %17 : vector<1x1x128xf32> to vector<1x128xf32>
    %c3_11 = arith.constant 3 : index
    %19 = memref.load %arg2[%c3_11] : memref<5xf32, #tpu.memory_space<smem>>
    %20 = vector.broadcast %19 : f32 to vector<1x128xf32>
    %21 = arith.mulf %18, %20 : vector<1x128xf32>
    %22 = arith.addf %16, %21 : vector<1x128xf32>
    %c4 = arith.constant 4 : index
    %c0_12 = arith.constant 0 : index
    %c0_13 = arith.constant 0 : index
    %23 = vector.load %arg1[%c4, %c0_12, %c0_13] : memref<5x1x128xf32, #tpu.memory_space<vmem>>, vector<1x1x128xf32>
    %24 = vector.shape_cast %23 : vector<1x1x128xf32> to vector<1x128xf32>
    %c4_14 = arith.constant 4 : index
    %25 = memref.load %arg2[%c4_14] : memref<5xf32, #tpu.memory_space<smem>>
    %26 = vector.broadcast %25 : f32 to vector<1x128xf32>
    %27 = arith.mulf %24, %26 : vector<1x128xf32>
    %28 = arith.addf %22, %27 : vector<1x128xf32>
    %c0_15 = arith.constant 0 : index
    %29 = memref.load %arg3[%c0_15] : memref<1xf32, #tpu.memory_space<smem>>
    %30 = vector.broadcast %29 : f32 to vector<1x128xf32>
    %31 = arith.addf %28, %30 : vector<1x128xf32>
    %cst = arith.constant 0.000000e+00 : f32
    %32 = vector.broadcast %cst : f32 to vector<1x128xf32>
    %33 = arith.subf %32, %31 : vector<1x128xf32>
    %34 = math.exp %33 : vector<1x128xf32>
    %cst_16 = arith.constant 1.000000e+00 : f32
    %35 = vector.broadcast %cst_16 : f32 to vector<1x128xf32>
    %36 = arith.addf %35, %34 : vector<1x128xf32>
    %cst_17 = arith.constant 1.000000e+00 : f32
    %37 = vector.broadcast %cst_17 : f32 to vector<1x128xf32>
    %38 = arith.divf %37, %36 : vector<1x128xf32>
    %c0_18 = arith.constant 0 : index
    %c0_19 = arith.constant 0 : index
    %39 = vector.load %arg4[%c0_18, %c0_19] : memref<1x128xf32, #tpu.memory_space<vmem>>, vector<1x128xf32>
    tpu.vector_store %arg4[%c0_18, %c0_19], %38 {strides = array<i32>} : memref<1x128xf32, #tpu.memory_space<vmem>>, vector<1x128xf32>,
    return
  }
  func.func @transform_0(%arg0: i32) -> (i32, i32, i32) {
    %c0_i32 = arith.constant 0 : i32
    %c0_i32_0 = arith.constant 0 : i32
    %c0_i32_1 = arith.constant 0 : i32
    return %c0_i32, %arg0, %c0_i32_0 : i32, i32, i32
  }
  func.func @transform_1(%arg0: i32) -> i32 {
    %c0_i32 = arith.constant 0 : i32
    %c0_i32_0 = arith.constant 0 : i32
    return %c0_i32 : i32
  }
  func.func @transform_2(%arg0: i32) -> i32 {
    %c0_i32 = arith.constant 0 : i32
    %c0_i32_0 = arith.constant 0 : i32
    return %c0_i32 : i32
  }
  func.func @transform_3(%arg0: i32) -> (i32, i32) {
    %c0_i32 = arith.constant 0 : i32
    %c0_i32_0 = arith.constant 0 : i32
    return %arg0, %c0_i32 : i32, i32
  }
}

</mosaic_0001>

<bundles_post_ra>
// kernel: tpu_custom_call.1
= control target key start
LH: loop header
LB: loop body
LE: loop exit
PB: predicated region body
PF: predicated region fallthrough
CT: control target
= control target key end

     0   :  { %9 = vsyncpa [#allocation4], 0  ;;  %s227_s0 = inlined_call_operand.hbm [shape: f32[5,1,128], index: 0, kind: input, shape index: {}]   ;;  %s228_s1 = inlined_call_operand.vmem [shape: f32[5], index: 1, kind: input, shape index: {}]   ;;  %s229_s2 = inlined_call_operand.<no memory space> [shape: f32[1], index: 2, kind: input, shape index: {}]   ;;  %s230_s3 = inlined_call_operand.hbm [shape: f32[1,128], index: 3, kind: output, shape index: {}]  }
   0x1   :  { %10 = vsyncpa [#allocation6], 0 }
   0x2   :  { %11 = vsyncpa [#allocation5], 0  ;;  %s172_s12 = smov [#allocation3]   ;;  %s30_s16 = sshll.u32 %s228_s1, 4  ;;  %s31_s16 = int_to_ptr.vmem [resolvable:$true] %s30_s16 }
   0x3   :  { %s17_s13 = sshll.u32 %s172_s12, 4  ;;  %s110_s19 = scalar_lea.hbm %s227_s0, 80  ;;  %s18_s13 = int_to_ptr.vmem [resolvable:$true] %s17_s13 }
   0x4   :  { %p111_p0 = scmp.ne.s32.totalorder %s227_s0, %s110_s19  ;;  %p114_p1 = scmp.lt.u32.totalorder %s110_s19, %s227_s0 }
   0x6   :  { %p116_p2 = pnand %p114_p1, %p111_p0 }
   0x8   :  { %119 = shalt.err (!%p116_p2)
}
   0x9   :  { %s120_s24 = scalar_lea.vmem %s18_s13, 80  ;;  %s124_s25 = scalar_lea.vmem %s18_s13, 96 }
   0xa   :  { %p121_p3 = scmp.ne.s32.totalorder %s18_s13, %s120_s24  ;;  %p125_p4 = scmp.lt.s32.totalorder %s18_s13, %s18_s13 }
   0xb   :  { %p126_p5 = scmp.lt.s32.totalorder %s124_s25, %s120_s24 }
   0xd   :  { %p127_p6 = por %p126_p5, %p125_p4 }
   0xf   :  { %p128_p7 = pnand %p127_p6, %p121_p3 }
  0x11   :  { %131 = shalt.err (!%p128_p7)
}
  0x12   :  { %s173_s1 = smov 16   ;;  %s174_s26 = smov 1  }
  0x13   :  { %23 = dma.hbm_to_vmem [thread:$0]  %s227_s0, 80, %s18_s13, [#allocation4], %s173_s1, %s173_s1, %s174_s26  }
  0x14   :  { %s132_s29 = scalar_lea.vmem %s31_s16, 16  ;;  %p137_p9 = scmp.lt.s32.totalorder %s31_s16, %s31_s16 }
  0x15   :  { %p133_p8 = scmp.ne.s32.totalorder %s31_s16, %s132_s29  ;;  %p138_p10 = scmp.lt.s32.totalorder %s132_s29, %s132_s29 }
  0x17   :  { %p139_p11 = por %p138_p10, %p137_p9 }
  0x19   :  { %p140_p12 = pnand %p139_p11, %p133_p8 }
  0x1b   :  { %143 = shalt.err (!%p140_p12)
}
  0x1c   :  { %s175_s30 = smov [#allocation7]  }
  0x1d   :  { %33 = dma.vmem_to_smem %s31_s16, 16, %s175_s30, [#allocation6]  }
  0x1e   :  { %166 = dma.done.wait [#allocation4], 80  }
  0x1f   :  { %167 = vsyncadd [#allocation4], 4294967216 }
  0x20   :  { %168 = dma.done.wait [#allocation6], 16  }
  0x21   :  { %169 = vsyncadd [#allocation6], 4294967280 }
  0x22   :  { %42 = sfence }
  0x23   :  { %s44_s4 = sld [smem:[#allocation7]]  ;;  %s97_s5 = sld [smem:[#allocation7 + $0x1]]  ;;  %v43_v0 = vld [vmem:[#allocation3] sm:$0x1]  ;;  %v48_v1 = vld [vmem:[#allocation3 + $0x1] sm:$0x1]  ;;  %v72_v18 = vstv %s229_s2 }
  0x24   :  { %s98_s6 = sld [smem:[#allocation7 + $0x2]]  ;;  %s99_s7 = sld [smem:[#allocation7 + $0x3]]  ;;  %v54_v2 = vld [vmem:[#allocation3 + $0x2] sm:$0x1]  ;;  %v60_v7 = vld [vmem:[#allocation3 + $0x3] sm:$0x1] }
  0x25   :  { %s100_s0 = sld [smem:[#allocation7 + $0x4]]  ;;  %v66_v11 = vld [vmem:[#allocation3 + $0x4] sm:$0x1]  ;;  %s176_s10 = smov [#allocation8]  }
  0x26   :  { %s87_s11 = sshll.u32 %s176_s10, 4  ;;  %s88_s11 = int_to_ptr.vmem [resolvable:$true] %s87_s11 }
  0x27   :  { %s144_s12 = scalar_lea.vmem %s88_s11, 16  ;;  %s148_s13 = scalar_lea.vmem %s88_s11, 32 }
  0x28   :  { %p145_p13 = scmp.ne.s32.totalorder %s88_s11, %s144_s12  ;;  %p149_p0 = scmp.lt.s32.totalorder %s88_s11, %s88_s11 }
  0x29   :  { %v45_v3 = vstv %s44_s4  ;;  %v50_v5 = vstv %s97_s5  ;;  %p150_p1 = scmp.lt.s32.totalorder %s148_s13, %s144_s12 }
  0x2a   :  { %v46_v4 = vmul.f32 %v45_v3, %v43_v0  ;;  %v56_v6 = vstv %s98_s6  ;;  %v51_v8 = vmul.f32 %v50_v5, %v48_v1  ;;  %v62_v10 = vstv %s99_s7 }
  0x2b   :  { %v57_v9 = vmul.f32 %v56_v6, %v54_v2  ;;  %v68_v12 = vstv %s100_s0  ;;  %v63_v14 = vmul.f32 %v62_v10, %v60_v7  ;;  %p151_p2 = por %p150_p1, %p149_p0 }
  0x2c   :  { %v52_v13 = vadd.f32 %v51_v8, %v46_v4  ;;  %v69_v16 = vmul.f32 %v68_v12, %v66_v11 }
  0x2d   :  { %p152_p3 = pnand %p151_p2, %p145_p13 }
  0x2e   :  { %v58_v15 = vadd.f32 %v57_v9, %v52_v13 }
  0x30   :  { %v64_v17 = vadd.f32 %v63_v14, %v58_v15 }
  0x32   :  { %v70_v19 = vadd.f32 %v69_v16, %v64_v17 }
  0x34   :  { %v73_v20 = vadd.f32 %v72_v18, %v70_v19 }
  0x36   :  { %v74_v21 = vsub.f32 0.0, %v73_v20 }
  0x38   :  { %v75_v22 = vmul.f32 1.442695, %v74_v21 }
  0x3a   :  { %106 = vpow2.f32 %v75_v22 }
  0x44   :  { %v107_v23 = vpop.eup %106 }
  0x45   :  { %v77_v24 = vadd.f32 1.0, %v107_v23 }
  0x47   :  { %108 = vrcp.f32 %v77_v24 }
  0x51   :  { %v109_v25 = vpop.eup %108 }
  0x52   :  { %80 = vst [vmem:[#allocation8] sm:$0x1] %v109_v25 }
  0x53   :  { %155 = shalt.err (!%p152_p3)
}
  0x54   :  { %s156_s15 = scalar_lea.hbm %s230_s3, 16 }
  0x55   :  { %p157_p4 = scmp.ne.s32.totalorder %s230_s3, %s156_s15  ;;  %p160_p5 = scmp.lt.u32.totalorder %s156_s15, %s230_s3 }
  0x57   :  { %p162_p6 = pnand %p160_p5, %p157_p4 }
  0x59   :  { %165 = shalt.err (!%p162_p6)
}
  0x5a   :  { %90 = dma.vmem_to_hbm [thread:$0]  %s88_s11, 16, %s230_s3, [#allocation5]  }
  0x5b   :  { %170 = dma.done.wait [#allocation5], 16  }
  0x5c   :  { %171 = vsyncadd [#allocation5], 4294967280 }
  0x5d   :  { %94 = vsyncpa [#allocation4], 1 }
  0x5e   :  { %95 = vsyncpa [#allocation5], 1 }
  0x5f   :  { %96 = vsyncpa [#allocation6], 1 }

</bundles_post_ra>
